<compile_context>
chip_gen: v6e
topology: v6e:2x2x1
jax: 0.10.0
libtpu: 0.0.40
codegen_flags: <defaults>
</compile_context>

<pallas_src>
import functools

import jax
import jax.numpy as jnp
from jax import lax
from jax.experimental import pallas as pl
from jax.experimental.pallas import tpu as pltpu

LN_EPS = 1e-5      # torch.nn.LayerNorm default
_LANE = 128        # TPU lane width
_SUBLANE = 8       # TPU sublane width
_VMEM_BUDGET = 40 * 1024 * 1024   # conservative: headroom under v7x 64 MiB/TC


def _round_up(n, m):
    return ((n + m - 1) // m) * m


def _plan_tiles(rows, d_in_p, d_hid_p, x_itemsize, w_itemsize):
    """Pick the largest row tile whose VMEM footprint fits the budget."""
    # Resident, single-buffered weights + small (8,128)-padded constant blocks.
    weight_bytes = 2 * d_in_p * d_hid_p * w_itemsize
    const_bytes = 4 * 2 * _SUBLANE * max(d_in_p, d_hid_p) * 4
    tile_rows = _SUBLANE
    for cand in (1024, 512, 256, 128, 64, 32, 16, 8):
        io_bytes = 2 * 2 * cand * d_in_p * x_itemsize       # 2x in + 2x out buffers
        hid_bytes = cand * d_hid_p * 4                       # f32 hidden intermediate
        if weight_bytes + const_bytes + io_bytes + hid_bytes <= _VMEM_BUDGET:
            tile_rows = cand
            break
    # Tiny inputs: one aligned block is enough (avoids wasted padded-row work).
    tile_rows = min(tile_rows, _round_up(rows, _SUBLANE))
    footprint = (weight_bytes + const_bytes
                 + 2 * 2 * tile_rows * d_in_p * x_itemsize
                 + tile_rows * d_hid_p * 4)
    # Request only what is needed (+ margin) -- never a whole v7x TC's 64 MiB.
    vmem_limit = int(min(footprint + (8 << 20), 100 << 20))
    return tile_rows, vmem_limit


# ----------------------------------------------------------------------------
# Kernels
# ----------------------------------------------------------------------------
def _layer_norm_epilogue(y, g, b, d_true, d_pad):
    """LayerNorm over the last axis; padded lanes of y are exactly zero."""
    inv_d = jnp.float32(1.0 / d_true)
    mean = jnp.sum(y, axis=-1, keepdims=True) * inv_d
    if d_true != d_pad:
        mask = lax.broadcasted_iota(jnp.int32, (1, d_pad), 1) < d_true
        diff = jnp.where(mask, y - mean, 0.0)
    else:
        diff = y - mean
    var = jnp.sum(diff * diff, axis=-1, keepdims=True) * inv_d
    norm = diff * lax.rsqrt(var + LN_EPS)
    return norm * g + b


def _ffn_conv_kernel(x_ref, w1_ref, b1_ref, w2_ref, b2_ref, g_ref, b_ref, o_ref,
                     *, d_true, d_pad):
    """Two-layer branch: out = LN( w2(relu(w1(x))) + x )."""
    x = x_ref[...]                                   # (TM, d_pad), native dtype
    xm = x.astype(w1_ref.dtype)                      # bf16 MXU path if requested
    h = jnp.dot(xm, w1_ref[...], preferred_element_type=jnp.float32)
    h = jnp.maximum(h + b1_ref[...].astype(jnp.float32), 0.0)          # ReLU
    out = jnp.dot(h.astype(w2_ref.dtype), w2_ref[...],
                  preferred_element_type=jnp.float32)
    out = out + b2_ref[...].astype(jnp.float32)
    y = out + x.astype(jnp.float32)                  # residual (f32 epilogue)
    o_ref[...] = _layer_norm_epilogue(
        y, g_ref[...].astype(jnp.float32), b_ref[...].astype(jnp.float32),
        d_true, d_pad).astype(o_ref.dtype)


def _ffn_onelayer_kernel(x_ref, w_ref, g_ref, b_ref, o_ref, *, d_true, d_pad):
    """One-layer branch (d_hid == d_in): out = LN( tanh(x @ W^T) + x )."""
    x = x_ref[...]
    xm = x.astype(w_ref.dtype)
    out = jnp.tanh(jnp.dot(xm, w_ref[...], preferred_element_type=jnp.float32))
    y = out + x.astype(jnp.float32)
    o_ref[...] = _layer_norm_epilogue(
        y, g_ref[...].astype(jnp.float32), b_ref[...].astype(jnp.float32),
        d_true, d_pad).astype(o_ref.dtype)


# ----------------------------------------------------------------------------
# Wrappers
# ----------------------------------------------------------------------------
@functools.partial(jax.jit, static_argnames=("use_bf16_matmul",))
def positionwise_ffn_conv(x, w1, b1, w2, b2, gamma, beta, *, use_bf16_matmul=False):
    """x: (B, S, d_in); w1: (d_in, d_hid); w2: (d_hid, d_in)."""
    B, S, d_in = x.shape
    d_hid = w1.shape[1]
    rows = B * S
    d_in_p = _round_up(d_in, _LANE)
    d_hid_p = _round_up(d_hid, _LANE)

    w_dtype = jnp.bfloat16 if use_bf16_matmul else w1.dtype
    x_isz = jnp.dtype(x.dtype).itemsize
    w_isz = jnp.dtype(w_dtype).itemsize
    tile_rows, vmem_limit = _plan_tiles(rows, d_in_p, d_hid_p, x_isz, w_isz)

    # Lane-axis padding only (no-op when dims are already 128-aligned).
    # Zero-padded weight columns/biases make padded lanes of y exactly 0 and
    # LayerNorm uses the true d_in, so results are unchanged.
    x2 = x.reshape(rows, d_in)
    if d_in_p != d_in:
        x2 = jnp.pad(x2, ((0, 0), (0, d_in_p - d_in)))
    w1p = jnp.pad(w1, ((0, d_in_p - d_in), (0, d_hid_p - d_hid))).astype(w_dtype)
    b1p = jnp.pad(b1, (0, d_hid_p - d_hid)).reshape(1, d_hid_p)
    w2p = jnp.pad(w2, ((0, d_hid_p - d_hid), (0, d_in_p - d_in))).astype(w_dtype)
    b2p = jnp.pad(b2, (0, d_in_p - d_in)).reshape(1, d_in_p)
    gp = jnp.pad(gamma, (0, d_in_p - d_in)).reshape(1, d_in_p)
    btp = jnp.pad(beta, (0, d_in_p - d_in)).reshape(1, d_in_p)

    grid = (pl.cdiv(rows, tile_rows),)    # ragged last block handled by Pallas
    cost = pl.CostEstimate(
        flops=2 * rows * d_in_p * d_hid_p * 2,
        transcendentals=rows,  # rsqrt per row
        bytes_accessed=int(
            x2.size * x_isz + (w1p.size + w2p.size) * w_isz
            + (b1p.size + b2p.size + gp.size + btp.size) * jnp.dtype(b1.dtype).itemsize
            + rows * d_in_p * x_isz),
    )
    kernel = functools.partial(_ffn_conv_kernel, d_true=d_in, d_pad=d_in_p)

    out = pl.pallas_call(
        kernel,
        out_shape=jax.ShapeDtypeStruct((rows, d_in_p), x.dtype),
        grid_spec=pltpu.PrefetchScalarGridSpec(
            num_scalar_prefetch=0,
            grid=grid,
            in_specs=[
                pl.BlockSpec((tile_rows, d_in_p), lambda i: (i, 0)),    # x rows
                pl.BlockSpec((d_in_p, d_hid_p), lambda i: (0, 0),       # w1 (resident)
                             pipeline_mode=pl.Buffered(1)),
                pl.BlockSpec((1, d_hid_p), lambda i: (0, 0),            # b1
                             pipeline_mode=pl.Buffered(1)),
                pl.BlockSpec((d_hid_p, d_in_p), lambda i: (0, 0),       # w2 (resident)
                             pipeline_mode=pl.Buffered(1)),
                pl.BlockSpec((1, d_in_p), lambda i: (0, 0),             # b2
                             pipeline_mode=pl.Buffered(1)),
                pl.BlockSpec((1, d_in_p), lambda i: (0, 0),             # gamma
                             pipeline_mode=pl.Buffered(1)),
                pl.BlockSpec((1, d_in_p), lambda i: (0, 0),             # beta
                             pipeline_mode=pl.Buffered(1)),
            ],
            out_specs=pl.BlockSpec((tile_rows, d_in_p), lambda i: (i, 0)),
        ),
        compiler_params=pltpu.CompilerParams(
            dimension_semantics=("parallel",),     # row tiles shard across TCs (v7x)
            vmem_limit_bytes=vmem_limit,
        ),
        cost_estimate=cost,
    )(x2, w1p, b1p, w2p, b2p, gp, btp)

    if d_in_p != d_in:
        out = out[:, :d_in]
    return out.reshape(B, S, d_in)


@functools.partial(jax.jit, static_argnames=("use_bf16_matmul",))
def positionwise_ffn_onelayer(x, w, gamma, beta, *, use_bf16_matmul=False):
    """x: (B, S, d_in); w: (d_in, d_in) (already transposed: y = x @ w)."""
    B, S, d_in = x.shape
    rows = B * S
    d_in_p = _round_up(d_in, _LANE)

    w_dtype = jnp.bfloat16 if use_bf16_matmul else w.dtype
    x_isz = jnp.dtype(x.dtype).itemsize
    w_isz = jnp.dtype(w_dtype).itemsize
    tile_rows, vmem_limit = _plan_tiles(rows, d_in_p, d_in_p, x_isz, w_isz)

    x2 = x.reshape(rows, d_in)
    if d_in_p != d_in:
        x2 = jnp.pad(x2, ((0, 0), (0, d_in_p - d_in)))
    wp = jnp.pad(w, ((0, d_in_p - d_in), (0, d_in_p - d_in))).astype(w_dtype)
    gp = jnp.pad(gamma, (0, d_in_p - d_in)).reshape(1, d_in_p)
    btp = jnp.pad(beta, (0, d_in_p - d_in)).reshape(1, d_in_p)

    grid = (pl.cdiv(rows, tile_rows),)
    cost = pl.CostEstimate(
        flops=2 * rows * d_in_p * d_in_p,
        transcendentals=rows * d_in_p + rows,  # tanh + rsqrt
        bytes_accessed=int(
            x2.size * x_isz + wp.size * w_isz
            + (gp.size + btp.size) * jnp.dtype(gamma.dtype).itemsize
            + rows * d_in_p * x_isz),
    )
    kernel = functools.partial(_ffn_onelayer_kernel, d_true=d_in, d_pad=d_in_p)

    out = pl.pallas_call(
        kernel,
        out_shape=jax.ShapeDtypeStruct((rows, d_in_p), x.dtype),
        grid_spec=pltpu.PrefetchScalarGridSpec(
            num_scalar_prefetch=0,
            grid=grid,
            in_specs=[
                pl.BlockSpec((tile_rows, d_in_p), lambda i: (i, 0)),    # x rows
                pl.BlockSpec((d_in_p, d_in_p), lambda i: (0, 0),        # w (resident)
                             pipeline_mode=pl.Buffered(1)),
                pl.BlockSpec((1, d_in_p), lambda i: (0, 0),             # gamma
                             pipeline_mode=pl.Buffered(1)),
                pl.BlockSpec((1, d_in_p), lambda i: (0, 0),             # beta
                             pipeline_mode=pl.Buffered(1)),
            ],
            out_specs=pl.BlockSpec((tile_rows, d_in_p), lambda i: (i, 0)),
        ),
        compiler_params=pltpu.CompilerParams(
            dimension_semantics=("parallel",),
            vmem_limit_bytes=vmem_limit,
        ),
        cost_estimate=cost,
    )(x2, wp, gp, btp)

    if d_in_p != d_in:
        out = out[:, :d_in]
    return out.reshape(B, S, d_in)


# ----------------------------------------------------------------------------
# Pure-JAX references for correctness checks
# ----------------------------------------------------------------------------
def _ref_conv(x, w1, b1, w2, b2, gamma, beta):
    h = jnp.maximum(jnp.einsum("bsd,dh->bsh", x, w1) + b1, 0.0)
    out = jnp.einsum("bsh,hd->bsd", h, w2) + b2
    y = out + x
    mean = jnp.mean(y, axis=-1, keepdims=True)
    var = jnp.mean((y - mean) ** 2, axis=-1, keepdims=True)
    return (y - mean) / jnp.sqrt(var + LN_EPS) * gamma + beta


def _ref_onelayer(x, w, gamma, beta):
    y = jnp.tanh(jnp.einsum("bsd,de->bse", x, w)) + x
    mean = jnp.mean(y, axis=-1, keepdims=True)
    var = jnp.mean((y - mean) ** 2, axis=-1, keepdims=True)
    return (y - mean) / jnp.sqrt(var + LN_EPS) * gamma + beta


# ----------------------------------------------------------------------------
if __name__ == "__main__":
    key = jax.random.PRNGKey(0)
    B, S, D_IN, D_HID = 2, 8, 32, 64

    ks = jax.random.split(key, 8)
    x = jax.random.normal(ks[0], (B, S, D_IN), jnp.float32)

    # Two-layer (conv) branch parameters: Conv1d(d_in, d_hid, 1) == linear.
    w1 = jax.random.normal(ks[1], (D_IN, D_HID), jnp.float32) * 0.1
    b1 = jax.random.normal(ks[2], (D_HID,), jnp.float32) * 0.1
    w2 = jax.random.normal(ks[3], (D_HID, D_IN), jnp.float32) * 0.1
    b2 = jax.random.normal(ks[4], (D_IN,), jnp.float32) * 0.1
    gamma = jnp.ones((D_IN,), jnp.float32)
    beta = jnp.zeros((D_IN,), jnp.float32)

    out_conv = jax.block_until_ready(
        positionwise_ffn_conv(x, w1, b1, w2, b2, gamma, beta))
    ref_conv = _ref_conv(x, w1, b1, w2, b2, gamma, beta)
    assert out_conv.shape == (B, S, D_IN)
    assert jnp.max(jnp.abs(out_conv - ref_conv)) < 1e-4

    # One-layer branch (d_hid == d_in): Linear(d_in, d_in, bias=False) + tanh.
    w = jax.random.normal(ks[5], (D_IN, D_IN), jnp.float32) * 0.1
    out_one = jax.block_until_ready(positionwise_ffn_onelayer(x, w, gamma, beta))
    ref_one = _ref_onelayer(x, w, gamma, beta)
    assert out_one.shape == (B, S, D_IN)
    assert jnp.max(jnp.abs(out_one - ref_one)) < 1e-4

    print("KERNEL_OK")
</pallas_src>

<mosaic_0001>
module attributes {stable_mosaic.version = 11 : i64} {
  func.func @_ffn_conv_kernel(%arg0: i32, %arg1: memref<16x128xf32, #tpu.memory_space<vmem>>, %arg2: memref<128x128xf32, #tpu.memory_space<vmem>>, %arg3: memref<1x128xf32, #tpu.memory_space<vmem>>, %arg4: memref<128x128xf32, #tpu.memory_space<vmem>>, %arg5: memref<1x128xf32, #tpu.memory_space<vmem>>, %arg6: memref<1x128xf32, #tpu.memory_space<vmem>>, %arg7: memref<1x128xf32, #tpu.memory_space<vmem>>, %arg8: memref<16x128xf32, #tpu.memory_space<vmem>>) attributes {dimension_semantics = [#tpu.dimension_semantics<parallel>], iteration_bounds = array<i64: 1>, scalar_prefetch = 0 : i64, scratch_operands = 0 : i64, tpu.core_type = #tpu.core_type<tc>, window_params = [{transform_indices = @transform_0, window_bounds = array<i64: 16, 128>}, {pipeline_mode = #tpu.pipeline_mode<synchronous>, transform_indices = @transform_1, window_bounds = array<i64: 128, 128>}, {pipeline_mode = #tpu.pipeline_mode<synchronous>, transform_indices = @transform_2, window_bounds = array<i64: 1, 128>}, {pipeline_mode = #tpu.pipeline_mode<synchronous>, transform_indices = @transform_3, window_bounds = array<i64: 128, 128>}, {pipeline_mode = #tpu.pipeline_mode<synchronous>, transform_indices = @transform_4, window_bounds = array<i64: 1, 128>}, {pipeline_mode = #tpu.pipeline_mode<synchronous>, transform_indices = @transform_5, window_bounds = array<i64: 1, 128>}, {pipeline_mode = #tpu.pipeline_mode<synchronous>, transform_indices = @transform_6, window_bounds = array<i64: 1, 128>}, {transform_indices = @transform_7, window_bounds = array<i64: 16, 128>}]} {
    %c0 = arith.constant 0 : index
    %c0_0 = arith.constant 0 : index
    %0 = vector.load %arg1[%c0, %c0_0] : memref<16x128xf32, #tpu.memory_space<vmem>>, vector<16x128xf32>
    %c0_1 = arith.constant 0 : index
    %c0_2 = arith.constant 0 : index
    %1 = vector.load %arg2[%c0_1, %c0_2] : memref<128x128xf32, #tpu.memory_space<vmem>>, vector<128x128xf32>
    %cst = arith.constant dense<0.000000e+00> : vector<16x128xf32>
    %2 = tpu.matmul %0, %1, %cst {dimension_numbers = #tpu.dot_dimension_numbers<[1], [0], [0], [1], [0, 0, 1, 1], [], []>} : vector<16x128xf32>, vector<128x128xf32>, vector<16x128xf32> -> vector<16x128xf32>
    %c0_3 = arith.constant 0 : index
    %c0_4 = arith.constant 0 : index
    %3 = vector.load %arg3[%c0_3, %c0_4] : memref<1x128xf32, #tpu.memory_space<vmem>>, vector<1x128xf32>
    %4 = vector.broadcast %3 : vector<1x128xf32> to vector<16x128xf32>
    %5 = arith.addf %2, %4 : vector<16x128xf32>
    %cst_5 = arith.constant 0.000000e+00 : f32
    %6 = vector.broadcast %cst_5 : f32 to vector<16x128xf32>
    %7 = arith.maximumf %5, %6 : vector<16x128xf32>
    %c0_6 = arith.constant 0 : index
    %c0_7 = arith.constant 0 : index
    %8 = vector.load %arg4[%c0_6, %c0_7] : memref<128x128xf32, #tpu.memory_space<vmem>>, vector<128x128xf32>
    %cst_8 = arith.constant dense<0.000000e+00> : vector<16x128xf32>
    %9 = tpu.matmul %7, %8, %cst_8 {dimension_numbers = #tpu.dot_dimension_numbers<[1], [0], [0], [1], [0, 0, 1, 1], [], []>} : vector<16x128xf32>, vector<128x128xf32>, vector<16x128xf32> -> vector<16x128xf32>
    %c0_9 = arith.constant 0 : index
    %c0_10 = arith.constant 0 : index
    %10 = vector.load %arg5[%c0_9, %c0_10] : memref<1x128xf32, #tpu.memory_space<vmem>>, vector<1x128xf32>
    %11 = vector.broadcast %10 : vector<1x128xf32> to vector<16x128xf32>
    %12 = arith.addf %9, %11 : vector<16x128xf32>
    %13 = arith.addf %12, %0 : vector<16x128xf32>
    %c0_11 = arith.constant 0 : index
    %c0_12 = arith.constant 0 : index
    %14 = vector.load %arg6[%c0_11, %c0_12] : memref<1x128xf32, #tpu.memory_space<vmem>>, vector<1x128xf32>
    %c0_13 = arith.constant 0 : index
    %c0_14 = arith.constant 0 : index
    %15 = vector.load %arg7[%c0_13, %c0_14] : memref<1x128xf32, #tpu.memory_space<vmem>>, vector<1x128xf32>
    %cst_15 = arith.constant dense<0.000000e+00> : vector<16xf32>
    %16 = vector.multi_reduction <add>, %13, %cst_15 [1] : vector<16x128xf32> to vector<16xf32>
    %17 = vector.shape_cast %16 : vector<16xf32> to vector<16x1xf32>
    %cst_16 = arith.constant 3.125000e-02 : f32
    %18 = vector.broadcast %cst_16 : f32 to vector<16x1xf32>
    %19 = arith.mulf %17, %18 : vector<16x1xf32>
    %20 = tpu.iota {dimensions = array<i32: 1>} : vector<1x128xi32>
    %c32_i32 = arith.constant 32 : i32
    %21 = vector.broadcast %c32_i32 : i32 to vector<1x128xi32>
    %22 = arith.cmpi slt, %20, %21 : vector<1x128xi32>
    %23 = vector.broadcast %19 : vector<16x1xf32> to vector<16x128xf32>
    %24 = arith.subf %13, %23 : vector<16x128xf32>
    %cst_17 = arith.constant 0.000000e+00 : f32
    %25 = vector.shape_cast %22 : vector<1x128xi1> to vector<1x128xi1>
    %26 = vector.broadcast %25 : vector<1x128xi1> to vector<16x128xi1>
    %27 = vector.broadcast %cst_17 : f32 to vector<16x128xf32>
    %28 = arith.select %26, %24, %27 : vector<16x128xi1>, vector<16x128xf32>
    %29 = arith.mulf %28, %28 : vector<16x128xf32>
    %cst_18 = arith.constant dense<0.000000e+00> : vector<16xf32>
    %30 = vector.multi_reduction <add>, %29, %cst_18 [1] : vector<16x128xf32> to vector<16xf32>
    %31 = vector.shape_cast %30 : vector<16xf32> to vector<16x1xf32>
    %cst_19 = arith.constant 3.125000e-02 : f32
    %32 = vector.broadcast %cst_19 : f32 to vector<16x1xf32>
    %33 = arith.mulf %31, %32 : vector<16x1xf32>
    %cst_20 = arith.constant 9.99999974E-6 : f32
    %34 = vector.broadcast %cst_20 : f32 to vector<16x1xf32>
    %35 = arith.addf %33, %34 : vector<16x1xf32>
    %36 = math.rsqrt %35 : vector<16x1xf32>
    %37 = vector.broadcast %36 : vector<16x1xf32> to vector<16x128xf32>
    %38 = arith.mulf %28, %37 : vector<16x128xf32>
    %39 = vector.broadcast %14 : vector<1x128xf32> to vector<16x128xf32>
    %40 = arith.mulf %38, %39 : vector<16x128xf32>
    %41 = vector.broadcast %15 : vector<1x128xf32> to vector<16x128xf32>
    %42 = arith.addf %40, %41 : vector<16x128xf32>
    %c0_21 = arith.constant 0 : index
    %c0_22 = arith.constant 0 : index
    %43 = vector.load %arg8[%c0_21, %c0_22] : memref<16x128xf32, #tpu.memory_space<vmem>>, vector<16x128xf32>
    tpu.vector_store %arg8[%c0_21, %c0_22], %42 {strides = array<i32>} : memref<16x128xf32, #tpu.memory_space<vmem>>, vector<16x128xf32>,
    return
  }
  func.func @transform_0(%arg0: i32) -> (i32, i32) {
    %c0_i32 = arith.constant 0 : i32
    %c0_i32_0 = arith.constant 0 : i32
    return %arg0, %c0_i32 : i32, i32
  }
  func.func @transform_1(%arg0: i32) -> (i32, i32) {
    %c0_i32 = arith.constant 0 : i32
    %c0_i32_0 = arith.constant 0 : i32
    %c0_i32_1 = arith.constant 0 : i32
    return %c0_i32, %c0_i32_0 : i32, i32
  }
  func.func @transform_2(%arg0: i32) -> (i32, i32) {
    %c0_i32 = arith.constant 0 : i32
    %c0_i32_0 = arith.constant 0 : i32
    %c0_i32_1 = arith.constant 0 : i32
    return %c0_i32, %c0_i32_0 : i32, i32
  }
  func.func @transform_3(%arg0: i32) -> (i32, i32) {
    %c0_i32 = arith.constant 0 : i32
    %c0_i32_0 = arith.constant 0 : i32
    %c0_i32_1 = arith.constant 0 : i32
    return %c0_i32, %c0_i32_0 : i32, i32
  }
  func.func @transform_4(%arg0: i32) -> (i32, i32) {
    %c0_i32 = arith.constant 0 : i32
    %c0_i32_0 = arith.constant 0 : i32
    %c0_i32_1 = arith.constant 0 : i32
    return %c0_i32, %c0_i32_0 : i32, i32
  }
  func.func @transform_5(%arg0: i32) -> (i32, i32) {
    %c0_i32 = arith.constant 0 : i32
    %c0_i32_0 = arith.constant 0 : i32
    %c0_i32_1 = arith.constant 0 : i32
    return %c0_i32, %c0_i32_0 : i32, i32
  }
  func.func @transform_6(%arg0: i32) -> (i32, i32) {
    %c0_i32 = arith.constant 0 : i32
    %c0_i32_0 = arith.constant 0 : i32
    %c0_i32_1 = arith.constant 0 : i32
    return %c0_i32, %c0_i32_0 : i32, i32
  }
  func.func @transform_7(%arg0: i32) -> (i32, i32) {
    %c0_i32 = arith.constant 0 : i32
    %c0_i32_0 = arith.constant 0 : i32
    return %arg0, %c0_i32 : i32, i32
  }
}

</mosaic_0001>

<bundles_post_ra>
// kernel: positionwise_ffn_conv.1
= control target key start
LH: loop header
LB: loop body
LE: loop exit
PB: predicated region body
PF: predicated region fallthrough
CT: control target
= control target key end

     0   :  { %v236_v48 = vlaneseq  ;;  %s559_s1 = inlined_call_operand.vmem [shape: f32[128,128], index: 1, kind: input, shape index: {}]   ;;  %s560_s0 = inlined_call_operand.vmem [shape: f32[16,128], index: 0, kind: input, shape index: {}]   ;;  %s561_s3 = inlined_call_operand.vmem [shape: f32[128,128], index: 3, kind: input, shape index: {}]   ;;  %s562_s2 = inlined_call_operand.vmem [shape: f32[1,128], index: 2, kind: input, shape index: {}]   ;;  %s563_s4 = inlined_call_operand.vmem [shape: f32[1,128], index: 4, kind: input, shape index: {}]   ;;  %s564_s5 = inlined_call_operand.vmem [shape: f32[1,128], index: 5, kind: input, shape index: {}]   ;;  %s565_s6 = inlined_call_operand.vmem [shape: f32[1,128], index: 6, kind: input, shape index: {}]   ;;  %s566_s7 = inlined_call_operand.vmem [shape: f32[16,128], index: 7, kind: output, shape index: {}]  }
   0x1   :  { %v43_v0 = vld [vmem:[%s559_s1 + $0x78] sm:$0xff]  ;;  %v42_v1 = vld [vmem:[%s559_s1 + $0x70] sm:$0xff]  ;;  %v41_v2 = vld [vmem:[%s559_s1 + $0x68] sm:$0xff] }
   0x2   :  { %321 = vmatprep.subr.mxu0 %v43_v0  ;;  %v40_v3 = vld [vmem:[%s559_s1 + $0x60] sm:$0xff]  ;;  %v39_v5 = vld [vmem:[%s559_s1 + $0x58] sm:$0xff]  ;;  %v142_v7 = vld [vmem:[%s561_s3 + $0x70] sm:$0xff]  ;;  %v237_v49 = vand.u32 127, %v236_v48 }
   0x3   :  { %322 = vmatpush3.msra.mxu0 %v43_v0  ;;  %v450_v4 = vld [vmem:[%s560_s0] sm:$0xff]  ;;  %v143_v6 = vld [vmem:[%s561_s3 + $0x78] sm:$0xff]  ;;  %v38_v8 = vld [vmem:[%s559_s1 + $0x50] sm:$0xff] }
   0x4   :  { %323 = vmatprep.subr.mxu0 %v42_v1  ;;  %353 = vmatprep.mubr.f32.mxu0 %v450_v4  ;;  %v141_v9 = vld [vmem:[%s561_s3 + $0x68] sm:$0xff]  ;;  %v140_v11 = vld [vmem:[%s561_s3 + $0x60] sm:$0xff]  ;;  %v139_v13 = vld [vmem:[%s561_s3 + $0x58] sm:$0xff]  ;;  %vm238_vm0 = vcmp.lt.s32.totalorder %v237_v49, 32 }
   0x5   :  { %324 = vmatpush3.msra.mxu0 %v42_v1  ;;  %356 = vmatprep.subr.mxu1 %v143_v6  ;;  %v37_v10 = vld [vmem:[%s559_s1 + $0x48] sm:$0xff]  ;;  %v36_v12 = vld [vmem:[%s559_s1 + $0x40] sm:$0xff]  ;;  %v35_v14 = vld [vmem:[%s559_s1 + $0x38] sm:$0xff] }
   0x6   :  { %325 = vmatprep.subr.mxu0 %v41_v2  ;;  %357 = vmatpush3.msra.mxu1 %v143_v6  ;;  %v138_v15 = vld [vmem:[%s561_s3 + $0x50] sm:$0xff]  ;;  %v137_v17 = vld [vmem:[%s561_s3 + $0x48] sm:$0xff]  ;;  %v136_v19 = vld [vmem:[%s561_s3 + $0x40] sm:$0xff] }
   0x7   :  { %326 = vmatpush3.msra.mxu0 %v41_v2  ;;  %358 = vmatprep.subr.mxu1 %v142_v7  ;;  %v34_v16 = vld [vmem:[%s559_s1 + $0x30] sm:$0xff]  ;;  %v33_v18 = vld [vmem:[%s559_s1 + $0x28] sm:$0xff]  ;;  %v32_v20 = vld [vmem:[%s559_s1 + $0x20] sm:$0xff] }
   0x8   :  { %327 = vmatprep.subr.mxu0 %v40_v3  ;;  %359 = vmatpush3.msra.mxu1 %v142_v7  ;;  %v135_v21 = vld [vmem:[%s561_s3 + $0x38] sm:$0xff]  ;;  %v134_v23 = vld [vmem:[%s561_s3 + $0x30] sm:$0xff]  ;;  %v133_v25 = vld [vmem:[%s561_s3 + $0x28] sm:$0xff] }
   0x9   :  { %328 = vmatpush3.msra.mxu0 %v40_v3  ;;  %360 = vmatprep.subr.mxu1 %v141_v9  ;;  %v31_v22 = vld [vmem:[%s559_s1 + $0x18] sm:$0xff]  ;;  %v30_v24 = vld [vmem:[%s559_s1 + $0x10] sm:$0xff]  ;;  %v29_v26 = vld [vmem:[%s559_s1 + $0x8] sm:$0xff] }
   0xa   :  { %329 = vmatprep.subr.mxu0 %v39_v5  ;;  %361 = vmatpush3.msra.mxu1 %v141_v9  ;;  %v132_v27 = vld [vmem:[%s561_s3 + $0x20] sm:$0xff]  ;;  %v27_v29 = vld [vmem:[%s560_s0 + $0x8] sm:$0xff]  ;;  %v131_v30 = vld [vmem:[%s561_s3 + $0x18] sm:$0xff] }
   0xb   :  { %330 = vmatpush3.msra.mxu0 %v39_v5  ;;  %362 = vmatprep.subr.mxu1 %v140_v11  ;;  %v28_v28 = vld [vmem:[%s559_s1] sm:$0xff]  ;;  %v130_v31 = vld [vmem:[%s561_s3 + $0x10] sm:$0xff]  ;;  %v129_v32 = vld [vmem:[%s561_s3 + $0x8] sm:$0xff] }
   0xc   :  { %331 = vmatprep.subr.mxu0 %v38_v8  ;;  %363 = vmatpush3.msra.mxu1 %v140_v11  ;;  %v128_v33 = vld [vmem:[%s561_s3] sm:$0xff] }
   0xd   :  { %332 = vmatpush3.msra.mxu0 %v38_v8  ;;  %364 = vmatprep.subr.mxu1 %v139_v13  ;;  %v281_v34 = vld [vmem:[%s562_s2] ss:$0 sm:$0xff] }
   0xe   :  { %333 = vmatprep.subr.mxu0 %v37_v10  ;;  %365 = vmatpush3.msra.mxu1 %v139_v13  ;;  %v282_v42 = vld [vmem:[%s563_s4] ss:$0 sm:$0xff] }
   0xf   :  { %334 = vmatpush3.msra.mxu0 %v37_v10  ;;  %366 = vmatprep.subr.mxu1 %v138_v15  ;;  %v283_v3 = vld [vmem:[%s564_s5] ss:$0 sm:$0xff] }
  0x10   :  { %335 = vmatprep.subr.mxu0 %v36_v12  ;;  %367 = vmatpush3.msra.mxu1 %v138_v15  ;;  %v284_v5 = vld [vmem:[%s565_s6] ss:$0 sm:$0xff] }
  0x11   :  { %336 = vmatpush3.msra.mxu0 %v36_v12  ;;  %368 = vmatprep.subr.mxu1 %v137_v17 }
  0x12   :  { %337 = vmatprep.subr.mxu0 %v35_v14  ;;  %369 = vmatpush3.msra.mxu1 %v137_v17 }
  0x13   :  { %338 = vmatpush3.msra.mxu0 %v35_v14  ;;  %370 = vmatprep.subr.mxu1 %v136_v19 }
  0x14   :  { %339 = vmatprep.subr.mxu0 %v34_v16  ;;  %371 = vmatpush3.msra.mxu1 %v136_v19 }
  0x15   :  { %340 = vmatpush3.msra.mxu0 %v34_v16  ;;  %372 = vmatprep.subr.mxu1 %v135_v21 }
  0x16   :  { %341 = vmatprep.subr.mxu0 %v33_v18  ;;  %373 = vmatpush3.msra.mxu1 %v135_v21 }
  0x17   :  { %342 = vmatpush3.msra.mxu0 %v33_v18  ;;  %374 = vmatprep.subr.mxu1 %v134_v23 }
  0x18   :  { %343 = vmatprep.subr.mxu0 %v32_v20  ;;  %375 = vmatpush3.msra.mxu1 %v134_v23 }
  0x19   :  { %344 = vmatpush3.msra.mxu0 %v32_v20  ;;  %376 = vmatprep.subr.mxu1 %v133_v25 }
  0x1a   :  { %345 = vmatprep.subr.mxu0 %v31_v22  ;;  %377 = vmatpush3.msra.mxu1 %v133_v25 }
  0x1b   :  { %346 = vmatpush3.msra.mxu0 %v31_v22  ;;  %378 = vmatprep.subr.mxu1 %v132_v27 }
  0x1c   :  { %347 = vmatprep.subr.mxu0 %v30_v24  ;;  %379 = vmatpush3.msra.mxu1 %v132_v27 }
  0x1d   :  { %348 = vmatpush3.msra.mxu0 %v30_v24  ;;  %380 = vmatprep.subr.mxu1 %v131_v30 }
  0x1e   :  { %349 = vmatprep.subr.mxu0 %v29_v26  ;;  %381 = vmatpush3.msra.mxu1 %v131_v30 }
  0x1f   :  { %350 = vmatpush3.msra.mxu0 %v29_v26  ;;  %382 = vmatprep.subr.mxu1 %v130_v31 }
  0x20   :  { %351 = vmatprep.subr.mxu0 %v28_v28  ;;  %383 = vmatpush3.msra.mxu1 %v130_v31 }
  0x21   :  { %352 = vmatpush3.msra.mxu0 %v28_v28  ;;  %384 = vmatprep.subr.mxu1 %v129_v32 }
  0x22   :  { %354 = vmatmul.mubr.f32.vlgmr.msra.gmra.mxu0 %v27_v29  ;;  %385 = vmatpush3.msra.mxu1 %v129_v32 }
  0x23   :  { %386 = vmatprep.subr.mxu1 %v128_v33 }
  0x24   :  { %387 = vmatpush3.msra.mxu1 %v128_v33 }
  0xe2   :  { %v355_v35 = vpop.f32.mrf.mxu0 }
  0xe3   :  { %v123_v36 = vadd.f32 %v355_v35, %v281_v34 }
  0xe4   :  { %v117_v37 = vpop.f32.mrf.mxu0 }
  0xe5   :  { %v118_v38 = vadd.f32 %v281_v34, %v117_v37  ;;  %v127_v40 = vmax.f32 %v123_v36, 0.0 }
  0xe7   :  { %v126_v39 = vmax.f32 %v118_v38, 0.0 }
  0xe9   :  { %388 = vmatprep.mubr.f32.mxu1 %v126_v39 }
  0xea   :  { %389 = vmatmul.mubr.f32.vlgmr.msra.gmra.mxu1 %v127_v40 }
 0x1aa   :  { %v390_v41 = vpop.f32.mrf.mxu1 }
 0x1ab   :  { %v223_v45 = vadd.f32 %v390_v41, %v282_v42 }
 0x1ac   :  { %v217_v43 = vpop.f32.mrf.mxu1 }
 0x1ad   :  { %v218_v44 = vadd.f32 %v282_v42, %v217_v43  ;;  %v227_v47 = vadd.f32 %v223_v45, %v27_v29 }
 0x1af   :  { %v226_v46 = vadd.f32 %v218_v44, %v450_v4 }
 0x1b1   :  { %230 = vadd.xlane.f32.xlu0 %v226_v46 }
 0x1b5   :  { %232 = vadd.xlane.f32.xlu0 %v227_v47 }
 0x23a   :  { %v231_v50 = vpop.xlane.xlu0 %230 }
 0x23b   :  { %v234_v51 = vmul.f32 0.03125, %v231_v50 }
 0x23d   :  { %v239_v52 = vsub.f32 %v226_v46, %v234_v51 }
 0x23e   :  { %v233_v53 = vpop.xlane.xlu0 %232 }
 0x23f   :  { %v235_v54 = vmul.f32 0.03125, %v233_v53  ;;  %v243_v55 = vsel %vm238_vm0, %v239_v52, 0.0 }
 0x240   :  { %v245_v56 = vmul.f32 %v243_v55, %v243_v55 }
 0x241   :  { %v240_v57 = vsub.f32 %v227_v47, %v235_v54 }
 0x242   :  { %247 = vadd.xlane.f32.xlu1 %v245_v56 }
 0x243   :  { %v244_v58 = vsel %vm238_vm0, %v240_v57, 0.0 }
 0x244   :  { %v246_v59 = vmul.f32 %v244_v58, %v244_v58 }
 0x246   :  { %249 = vadd.xlane.f32.xlu1 %v246_v59 }
 0x2cb   :  { %v248_v60 = vpop.xlane.xlu1 %247 }
 0x2cc   :  { %v251_v61 = vmul.f32 0.03125, %v248_v60 }
 0x2ce   :  { %v253_v62 = vadd.f32 1e-05, %v251_v61 }
 0x2cf   :  { %v250_v63 = vpop.xlane.xlu1 %249 }
 0x2d0   :  { %391 = vrsqrt.f32 %v253_v62  ;;  %v252_v0 = vmul.f32 0.03125, %v250_v63 }
 0x2d2   :  { %v254_v1 = vadd.f32 1e-05, %v252_v0 }
 0x2d4   :  { %393 = vrsqrt.f32 %v254_v1 }
 0x2dd   :  { %v392_v2 = vpop.eup %391 }
 0x2de   :  { %v257_v4 = vmul.f32 %v392_v2, %v243_v55 }
 0x2e0   :  { %v265_v6 = vmul.f32 %v283_v3, %v257_v4 }
 0x2e1   :  { %v394_v7 = vpop.eup %393 }
 0x2e2   :  { %v273_v8 = vadd.f32 %v284_v5, %v265_v6  ;;  %v258_v9 = vmul.f32 %v394_v7, %v244_v58 }
 0x2e4   :  { %275 = vst [vmem:[%s566_s7] sm:$0xff] %v273_v8  ;;  %v266_v10 = vmul.f32 %v283_v3, %v258_v9 }
 0x2e6   :  { %v274_v11 = vadd.f32 %v284_v5, %v266_v10 }
 0x2e8   :  { %276 = vst [vmem:[%s566_s7 + $0x8] sm:$0xff] %v274_v11 }

</bundles_post_ra>
